<compile_context>
chip_gen: v7x
topology: tpu7x:2x2x1
jax: 0.10.0
libtpu: 0.0.40
codegen_flags: <defaults>
</compile_context>

<pallas_src>
import jax
import jax.numpy as jnp
from jax.experimental import pallas as pl
from jax.experimental.pallas import tpu as pltpu


def _round_up(n, m):
    return ((n + m - 1) // m) * m


def _cdiv(a, b):
    return -(-a // b)


def _pad2d(a, shape):
    return jnp.pad(a, ((0, shape[0] - a.shape[0]), (0, shape[1] - a.shape[1])))


def _bf16_elementwise_ok():
    """bf16 VPU path exists on v6e/v7x; keep f32 elementwise on v5e and older."""
    try:
        kind = jax.devices()[0].device_kind.lower()
    except Exception:
        return False
    return not any(t in kind for t in ("v2", "v3", "v4", "v5"))


# ---------------------------------------------------------------------------
# Kernel
# ---------------------------------------------------------------------------
def qnetwork_kernel(x_ref, w1_ref, b1_ref, w2_ref, b2_ref, w3_ref, b3_ref, o_ref):
    mm_dtype = w1_ref.dtype          # matmul operand dtype (bf16 or f32)
    ew_dtype = b1_ref.dtype          # elementwise dtype (bf16 on v6e/v7x, f32 on v5e)

    # fc1 + ReLU: MXU matmul with f32 accumulation; bias add + ReLU in ew_dtype.
    h = jnp.dot(x_ref[...].astype(mm_dtype), w1_ref[...],
                preferred_element_type=jnp.float32)
    h = jnp.maximum(h.astype(ew_dtype) + b1_ref[...], 0)

    # fc2 + ReLU
    h = jnp.dot(h.astype(w2_ref.dtype), w2_ref[...],
                preferred_element_type=jnp.float32)
    h = jnp.maximum(h.astype(ew_dtype) + b2_ref[...], 0)

    # fc3 (no activation): output block is (bt, action_size), stored directly.
    o = jnp.dot(h.astype(w3_ref.dtype), w3_ref[...],
                preferred_element_type=jnp.float32)
    o_ref[...] = (o + b3_ref[...]).astype(o_ref.dtype)


# ---------------------------------------------------------------------------
# Wrapper
# ---------------------------------------------------------------------------
def prepare_params(params, *, compute_dtype=jnp.bfloat16, elementwise_dtype=None):
    """Pad + cast weights once (call outside the per-forward hot path).

    params: dict of w1,b1,w2,b2,w3,b3 with w_i = [in, out], b_i = [1, out] (f32).
    """
    if elementwise_dtype is None:
        if compute_dtype == jnp.float32:
            elementwise_dtype = jnp.float32
        else:
            elementwise_dtype = jnp.bfloat16 if _bf16_elementwise_ok() else jnp.float32

    w1, b1, w2, b2, w3, b3 = (params[k] for k in ("w1", "b1", "w2", "b2", "w3", "b3"))
    S, H1 = w1.shape
    H2 = w2.shape[1]

    # Lane-dense zero padding of the first hidden dim (exact).
    H1p = _round_up(H1, 128)
    return dict(
        w1=_pad2d(w1, (S, H1p)).astype(compute_dtype),
        b1=_pad2d(b1, (1, H1p)).astype(elementwise_dtype),
        w2=_pad2d(w2, (H1p, H2)).astype(compute_dtype),
        b2=b2.astype(elementwise_dtype),
        w3=w3.astype(compute_dtype),       # output dim stays at action_size
        b3=b3.astype(jnp.float32),         # final bias add in f32 (4-wide, negligible)
    )


def _choose_batch_tiling(B, b_tile, min_tiles):
    """Balanced batch tiles: multiple of 8, <= b_tile, >= min_tiles tiles when possible."""
    B = max(B, 1)
    max_tiles = _cdiv(B, 8)                      # can't go below 8 rows per tile
    n = min(max(_cdiv(B, b_tile), min_tiles), max_tiles)
    bt = _round_up(_cdiv(B, n), 8)
    Bp = _round_up(B, bt)
    return bt, Bp


def qnetwork_forward(x, prepared_params, *, b_tile=4096, min_tiles=2):
    """Forward pass of QNetwork.

    x: [B, state_size] float32.
    prepared_params: output of prepare_params().
    Returns [B, action_size] float32.
    """
    w1, b1, w2, b2, w3, b3 = (prepared_params[k]
                              for k in ("w1", "b1", "w2", "b2", "w3", "b3"))
    B, S = x.shape
    A = w3.shape[1]

    bt, Bp = _choose_batch_tiling(B, b_tile, min_tiles)
    xp = x if Bp == B else jnp.pad(x, ((0, Bp - B), (0, 0)))
    grid = (Bp // bt,)

    # Weights/biases use full-array blocks with a constant index_map -> they stay
    # VMEM-resident across grid steps while x / out tiles are double-buffered.
    def resident(a):
        return pl.BlockSpec(a.shape, lambda i: (0, 0))

    out = pl.pallas_call(
        qnetwork_kernel,
        out_shape=jax.ShapeDtypeStruct((Bp, A), jnp.float32),
        grid=grid,
        in_specs=[
            pl.BlockSpec((bt, S), lambda i: (i, 0)),   # activations pipeline over batch
            resident(w1), resident(b1),
            resident(w2), resident(b2),
            resident(w3), resident(b3),
        ],
        out_specs=pl.BlockSpec((bt, A), lambda i: (i, 0)),
        compiler_params=pltpu.CompilerParams(
            dimension_semantics=("parallel",),  # v7x: shard batch tiles over both TCs
        ),
    )(xp, w1, b1, w2, b2, w3, b3)

    return out if Bp == B else out[:B]


# ---------------------------------------------------------------------------
# Params / reference (for the self-test)
# ---------------------------------------------------------------------------
def init_linear(key, fan_in, fan_out):
    """Deterministic init mimicking nn.Linear's U(-1/sqrt(fan_in), 1/sqrt(fan_in))."""
    kw, kb = jax.random.split(key)
    bound = 1.0 / jnp.sqrt(jnp.float32(fan_in))
    w = jax.random.uniform(kw, (fan_in, fan_out), jnp.float32, -bound, bound)
    b = jax.random.uniform(kb, (1, fan_out), jnp.float32, -bound, bound)
    return w, b


def make_params(key, state_size, action_size, h1=132, h2=64):
    k1, k2, k3 = jax.random.split(key, 3)
    w1, b1 = init_linear(k1, state_size, h1)
    w2, b2 = init_linear(k2, h1, h2)
    w3, b3 = init_linear(k3, h2, action_size)
    return dict(w1=w1, b1=b1, w2=w2, b2=b2, w3=w3, b3=b3)


def reference_forward(x, p):
    h = jnp.maximum(x @ p["w1"] + p["b1"], 0.0)
    h = jnp.maximum(h @ p["w2"] + p["b2"], 0.0)
    return h @ p["w3"] + p["b3"]


if __name__ == "__main__":
    batch = 8
    state_size = 8
    action_size = 4

    key = jax.random.PRNGKey(0)
    kx, kp = jax.random.split(key)

    x = jax.random.normal(kx, (batch, state_size), jnp.float32)
    params = make_params(kp, state_size, action_size, h1=132, h2=64)
    ref = reference_forward(x, params)

    # f32 path: padding / batch tiling must be numerically transparent.
    p_f32 = prepare_params(params, compute_dtype=jnp.float32)
    out_f32 = jax.block_until_ready(qnetwork_forward(x, p_f32))
    assert out_f32.shape == (batch, action_size)
    assert jnp.allclose(out_f32, ref, atol=1e-4, rtol=1e-4), "f32 mismatch vs reference"

    # Default bf16-operand path (f32 accumulation): looser tolerance for bf16.
    p_bf16 = prepare_params(params)
    out_bf16 = jax.block_until_ready(qnetwork_forward(x, p_bf16))
    assert out_bf16.shape == (batch, action_size)
    assert jnp.allclose(out_bf16, ref, atol=5e-2, rtol=5e-2), "bf16 mismatch vs reference"

    # Non-multiple batch exercises balanced tiling + row padding (>= 2 grid steps).
    x2 = jax.random.normal(kx, (37, state_size), jnp.float32)
    out2 = jax.block_until_ready(qnetwork_forward(x2, p_f32, b_tile=16))
    assert out2.shape == (37, action_size)
    assert jnp.allclose(out2, reference_forward(x2, params), atol=1e-4, rtol=1e-4), \
        "tiled-batch mismatch vs reference"

    print("KERNEL_OK")
</pallas_src>

<mosaic_0001>
module attributes {stable_mosaic.version = 11 : i64} {
  func.func @qnetwork_kernel(%arg0: i32, %arg1: memref<8x8xf32, #tpu.memory_space<vmem>>, %arg2: memref<8x256xf32, #tpu.memory_space<vmem>>, %arg3: memref<1x256xf32, #tpu.memory_space<vmem>>, %arg4: memref<256x64xf32, #tpu.memory_space<vmem>>, %arg5: memref<1x64xf32, #tpu.memory_space<vmem>>, %arg6: memref<64x4xf32, #tpu.memory_space<vmem>>, %arg7: memref<1x4xf32, #tpu.memory_space<vmem>>, %arg8: memref<8x4xf32, #tpu.memory_space<vmem>>) attributes {dimension_semantics = [#tpu.dimension_semantics<parallel>], iteration_bounds = array<i64: 1>, scalar_prefetch = 0 : i64, scratch_operands = 0 : i64, tpu.core_type = #tpu.core_type<tc>, window_params = [{transform_indices = @transform_0, window_bounds = array<i64: 8, 8>}, {pipeline_mode = #tpu.pipeline_mode<synchronous>, transform_indices = @transform_1, window_bounds = array<i64: 8, 256>}, {pipeline_mode = #tpu.pipeline_mode<synchronous>, transform_indices = @transform_2, window_bounds = array<i64: 1, 256>}, {pipeline_mode = #tpu.pipeline_mode<synchronous>, transform_indices = @transform_3, window_bounds = array<i64: 256, 64>}, {pipeline_mode = #tpu.pipeline_mode<synchronous>, transform_indices = @transform_4, window_bounds = array<i64: 1, 64>}, {pipeline_mode = #tpu.pipeline_mode<synchronous>, transform_indices = @transform_5, window_bounds = array<i64: 64, 4>}, {pipeline_mode = #tpu.pipeline_mode<synchronous>, transform_indices = @transform_6, window_bounds = array<i64: 1, 4>}, {transform_indices = @transform_7, window_bounds = array<i64: 8, 4>}]} {
    %c0 = arith.constant 0 : index
    %c0_0 = arith.constant 0 : index
    %0 = vector.load %arg1[%c0, %c0_0] : memref<8x8xf32, #tpu.memory_space<vmem>>, vector<8x8xf32>
    %c0_1 = arith.constant 0 : index
    %c0_2 = arith.constant 0 : index
    %1 = vector.load %arg2[%c0_1, %c0_2] : memref<8x256xf32, #tpu.memory_space<vmem>>, vector<8x256xf32>
    %cst = arith.constant dense<0.000000e+00> : vector<8x256xf32>
    %2 = tpu.matmul %0, %1, %cst {dimension_numbers = #tpu.dot_dimension_numbers<[1], [0], [0], [1], [0, 0, 1, 1], [], []>} : vector<8x8xf32>, vector<8x256xf32>, vector<8x256xf32> -> vector<8x256xf32>
    %c0_3 = arith.constant 0 : index
    %c0_4 = arith.constant 0 : index
    %3 = vector.load %arg3[%c0_3, %c0_4] : memref<1x256xf32, #tpu.memory_space<vmem>>, vector<1x256xf32>
    %4 = vector.broadcast %3 : vector<1x256xf32> to vector<8x256xf32>
    %5 = arith.addf %2, %4 : vector<8x256xf32>
    %cst_5 = arith.constant 0.000000e+00 : f32
    %6 = vector.broadcast %cst_5 : f32 to vector<8x256xf32>
    %7 = arith.maximumf %5, %6 : vector<8x256xf32>
    %c0_6 = arith.constant 0 : index
    %c0_7 = arith.constant 0 : index
    %8 = vector.load %arg4[%c0_6, %c0_7] : memref<256x64xf32, #tpu.memory_space<vmem>>, vector<256x64xf32>
    %cst_8 = arith.constant dense<0.000000e+00> : vector<8x64xf32>
    %9 = tpu.matmul %7, %8, %cst_8 {dimension_numbers = #tpu.dot_dimension_numbers<[1], [0], [0], [1], [0, 0, 1, 1], [], []>} : vector<8x256xf32>, vector<256x64xf32>, vector<8x64xf32> -> vector<8x64xf32>
    %c0_9 = arith.constant 0 : index
    %c0_10 = arith.constant 0 : index
    %10 = vector.load %arg5[%c0_9, %c0_10] : memref<1x64xf32, #tpu.memory_space<vmem>>, vector<1x64xf32>
    %11 = vector.broadcast %10 : vector<1x64xf32> to vector<8x64xf32>
    %12 = arith.addf %9, %11 : vector<8x64xf32>
    %cst_11 = arith.constant 0.000000e+00 : f32
    %13 = vector.broadcast %cst_11 : f32 to vector<8x64xf32>
    %14 = arith.maximumf %12, %13 : vector<8x64xf32>
    %c0_12 = arith.constant 0 : index
    %c0_13 = arith.constant 0 : index
    %15 = vector.load %arg6[%c0_12, %c0_13] : memref<64x4xf32, #tpu.memory_space<vmem>>, vector<64x4xf32>
    %cst_14 = arith.constant dense<0.000000e+00> : vector<8x4xf32>
    %16 = tpu.matmul %14, %15, %cst_14 {dimension_numbers = #tpu.dot_dimension_numbers<[1], [0], [0], [1], [0, 0, 1, 1], [], []>} : vector<8x64xf32>, vector<64x4xf32>, vector<8x4xf32> -> vector<8x4xf32>
    %c0_15 = arith.constant 0 : index
    %c0_16 = arith.constant 0 : index
    %17 = vector.load %arg7[%c0_15, %c0_16] : memref<1x4xf32, #tpu.memory_space<vmem>>, vector<1x4xf32>
    %18 = vector.broadcast %17 : vector<1x4xf32> to vector<8x4xf32>
    %19 = arith.addf %16, %18 : vector<8x4xf32>
    %c0_17 = arith.constant 0 : index
    %c0_18 = arith.constant 0 : index
    %20 = vector.load %arg8[%c0_17, %c0_18] : memref<8x4xf32, #tpu.memory_space<vmem>>, vector<8x4xf32>
    tpu.vector_store %arg8[%c0_17, %c0_18], %19 {strides = array<i32>} : memref<8x4xf32, #tpu.memory_space<vmem>>, vector<8x4xf32>,
    return
  }
  func.func @transform_0(%arg0: i32) -> (i32, i32) {
    %c0_i32 = arith.constant 0 : i32
    %c0_i32_0 = arith.constant 0 : i32
    return %arg0, %c0_i32 : i32, i32
  }
  func.func @transform_1(%arg0: i32) -> (i32, i32) {
    %c0_i32 = arith.constant 0 : i32
    %c0_i32_0 = arith.constant 0 : i32
    %c0_i32_1 = arith.constant 0 : i32
    return %c0_i32, %c0_i32_0 : i32, i32
  }
  func.func @transform_2(%arg0: i32) -> (i32, i32) {
    %c0_i32 = arith.constant 0 : i32
    %c0_i32_0 = arith.constant 0 : i32
    %c0_i32_1 = arith.constant 0 : i32
    return %c0_i32, %c0_i32_0 : i32, i32
  }
  func.func @transform_3(%arg0: i32) -> (i32, i32) {
    %c0_i32 = arith.constant 0 : i32
    %c0_i32_0 = arith.constant 0 : i32
    %c0_i32_1 = arith.constant 0 : i32
    return %c0_i32, %c0_i32_0 : i32, i32
  }
  func.func @transform_4(%arg0: i32) -> (i32, i32) {
    %c0_i32 = arith.constant 0 : i32
    %c0_i32_0 = arith.constant 0 : i32
    %c0_i32_1 = arith.constant 0 : i32
    return %c0_i32, %c0_i32_0 : i32, i32
  }
  func.func @transform_5(%arg0: i32) -> (i32, i32) {
    %c0_i32 = arith.constant 0 : i32
    %c0_i32_0 = arith.constant 0 : i32
    %c0_i32_1 = arith.constant 0 : i32
    return %c0_i32, %c0_i32_0 : i32, i32
  }
  func.func @transform_6(%arg0: i32) -> (i32, i32) {
    %c0_i32 = arith.constant 0 : i32
    %c0_i32_0 = arith.constant 0 : i32
    %c0_i32_1 = arith.constant 0 : i32
    return %c0_i32, %c0_i32_0 : i32, i32
  }
  func.func @transform_7(%arg0: i32) -> (i32, i32) {
    %c0_i32 = arith.constant 0 : i32
    %c0_i32_0 = arith.constant 0 : i32
    return %arg0, %c0_i32 : i32, i32
  }
}

</mosaic_0001>

<bundles_post_ra>
// kernel: tpu_custom_call.1
= control target key start
LH: loop header
LB: loop body
LE: loop exit
PB: predicated region body
PF: predicated region fallthrough
CT: control target
= control target key end

     0   :  { %v437_v2 = vmov 0.0   ;;  %vm41_vm0 = vcmask 64512   ;;  %v438_v52 = vmov 0.0|0.0   ;;  %v31_v59 = vlaneseq  ;;  %s623_s1 = inlined_call_operand.vmem [shape: f32[8,256], index: 1, kind: input, shape index: {}]   ;;  %s624_s0 = inlined_call_operand.vmem [shape: f32[8,8], index: 0, kind: input, shape index: {}]   ;;  %s625_s3 = inlined_call_operand.vmem [shape: f32[256,64], index: 3, kind: input, shape index: {}]   ;;  %s626_s5 = inlined_call_operand.vmem [shape: f32[64,4], index: 5, kind: input, shape index: {}]   ;;  %s627_s2 = inlined_call_operand.vmem [shape: f32[1,256], index: 2, kind: input, shape index: {}]   ;;  %s628_s4 = inlined_call_operand.vmem [shape: f32[1,64], index: 4, kind: input, shape index: {}]   ;;  %s629_s6 = inlined_call_operand.vmem [shape: f32[1,4], index: 6, kind: input, shape index: {}]   ;;  %s630_s7 = inlined_call_operand.vmem [shape: f32[8,4], index: 7, kind: output, shape index: {}]  }
   0x1   :  { %v28_v0 = vld [vmem:[%s623_s1 + $0x8] sm:$0xff]  ;;  %v27_v1 = vld [vmem:[%s623_s1] sm:$0xff]  ;;  %109 = vmatprep.mubr.f32.mxu0 %v437_v2  ;;  %v136_v9 = vld [vmem:[%s625_s3 + $0x90] sm:$0xff]  ;;  %vm439_vm1 = vmmov 0   ;;  %vm243_vm2 = vcmask 523264   ;;  %vm317_vm3 = vcmask 31744  }
   0x2   :  { %v26_v3 = vld [vmem:[%s624_s0] sm:$0xff]  ;;  %45 = vmatprep.subr.mxu0 %v28_v0  ;;  %v135_v5 = vld [vmem:[%s625_s3 + $0x88] sm:$0xff]  ;;  %v137_v10 = vld [vmem:[%s625_s3 + $0x98] sm:$0xff]  ;;  %v32_v60 = vshrl.u32 %v31_v59, 7 }
   0x3   :  { %v134_v4 = vld [vmem:[%s625_s3 + $0x80] sm:$0xff]  ;;  %46 = vmatpush1.msra.mxu0 %v27_v1  ;;  %v119_v8 = vld [vmem:[%s625_s3 + $0x8] sm:$0xff]  ;;  %v394_v12 = vpack.c.bf16 %v137_v10, %v136_v9  ;;  %v120_v13 = vld [vmem:[%s625_s3 + $0x10] sm:$0xff] }
   0x4   :  { %v118_v6 = vld [vmem:[%s625_s3] sm:$0xff]  ;;  %v390_v7 = vpack.c.bf16 %v135_v5, %v134_v4  ;;  %323 = vmatmul.mubr.msk.f32.vlgmr.msra.gmra.mrb[0].mxu0 %vm41_vm0, %v26_v3  ;;  %v121_v14 = vld [vmem:[%s625_s3 + $0x18] sm:$0xff]  ;;  %v139_v16 = vld [vmem:[%s625_s3 + $0xa8] sm:$0xff]  ;;  %422 = vmatprep.subr.bf16.mxu0 %v438_v52  ;;  %v33_v61 = vsub.s32 0, %v32_v60  ;;  %v37_v63 = vsub.s32 1, %v32_v60 }
   0x5   :  { %v392_v11 = vpack.c.bf16 %v119_v8, %v118_v6  ;;  %v138_v15 = vld [vmem:[%s625_s3 + $0xa0] sm:$0xff]  ;;  %v396_v17 = vpack.c.bf16 %v121_v14, %v120_v13  ;;  %v123_v20 = vld [vmem:[%s625_s3 + $0x28] sm:$0xff]  ;;  %v140_v21 = vld [vmem:[%s625_s3 + $0xb0] sm:$0xff]  ;;  %387 = vmatprep.mubr.msk.f32.mxu0 %vm439_vm1, %v437_v2 }
   0x6   :  { %391 = vmatprep.subr.bf16.mxu1 %v390_v7  ;;  %v398_v18 = vpack.c.bf16 %v139_v16, %v138_v15  ;;  %v122_v19 = vld [vmem:[%s625_s3 + $0x20] sm:$0xff]  ;;  %v141_v22 = vld [vmem:[%s625_s3 + $0xb8] sm:$0xff]  ;;  %v124_v25 = vld [vmem:[%s625_s3 + $0x30] sm:$0xff] }
   0x7   :  { %393 = vmatpush3.bf16.msra.mxu1 %v392_v11  ;;  %v400_v23 = vpack.c.bf16 %v123_v20, %v122_v19  ;;  %v402_v24 = vpack.c.bf16 %v141_v22, %v140_v21  ;;  %v125_v26 = vld [vmem:[%s625_s3 + $0x38] sm:$0xff]  ;;  %v142_v27 = vld [vmem:[%s625_s3 + $0xc0] sm:$0xff]  ;;  %v143_v28 = vld [vmem:[%s625_s3 + $0xc8] sm:$0xff] }
   0x8   :  { %395 = vmatprep.subr.bf16.mxu1 %v394_v12  ;;  %v404_v29 = vpack.c.bf16 %v125_v26, %v124_v25  ;;  %v406_v30 = vpack.c.bf16 %v143_v28, %v142_v27  ;;  %v126_v31 = vld [vmem:[%s625_s3 + $0x40] sm:$0xff]  ;;  %v127_v32 = vld [vmem:[%s625_s3 + $0x48] sm:$0xff]  ;;  %v144_v33 = vld [vmem:[%s625_s3 + $0xd0] sm:$0xff] }
   0x9   :  { %v145_v34 = vld [vmem:[%s625_s3 + $0xd8] sm:$0xff]  ;;  %v408_v35 = vpack.c.bf16 %v127_v32, %v126_v31  ;;  %v128_v37 = vld [vmem:[%s625_s3 + $0x50] sm:$0xff]  ;;  %v146_v39 = vld [vmem:[%s625_s3 + $0xe0] sm:$0xff] }
   0xa   :  { %v410_v36 = vpack.c.bf16 %v145_v34, %v144_v33  ;;  %v129_v38 = vld [vmem:[%s625_s3 + $0x58] sm:$0xff]  ;;  %v147_v40 = vld [vmem:[%s625_s3 + $0xe8] sm:$0xff]  ;;  %v130_v43 = vld [vmem:[%s625_s3 + $0x60] sm:$0xff] }
   0xb   :  { %397 = vmatpush3.bf16.msra.mxu1 %v396_v17  ;;  %v412_v41 = vpack.c.bf16 %v129_v38, %v128_v37  ;;  %v414_v42 = vpack.c.bf16 %v147_v40, %v146_v39  ;;  %v131_v44 = vld [vmem:[%s625_s3 + $0x68] sm:$0xff]  ;;  %v148_v46 = vld [vmem:[%s625_s3 + $0xf0] sm:$0xff]  ;;  %v149_v47 = vld [vmem:[%s625_s3 + $0xf8] sm:$0xff] }
   0xc   :  { %399 = vmatprep.subr.bf16.mxu1 %v398_v18  ;;  %v416_v45 = vpack.c.bf16 %v131_v44, %v130_v43  ;;  %v418_v48 = vpack.c.bf16 %v149_v47, %v148_v46  ;;  %v132_v49 = vld [vmem:[%s625_s3 + $0x70] sm:$0xff]  ;;  %v133_v50 = vld [vmem:[%s625_s3 + $0x78] sm:$0xff]  ;;  %v228_v53 = vld [vmem:[%s626_s5] sm:$0xff] }
   0xd   :  { %v420_v51 = vpack.c.bf16 %v133_v50, %v132_v49  ;;  %v229_v54 = vld [vmem:[%s626_s5 + $0x8] sm:$0xff]  ;;  %v230_v55 = vld [vmem:[%s626_s5 + $0x10] sm:$0xff]  ;;  %v231_v57 = vld [vmem:[%s626_s5 + $0x18] sm:$0xff] }
   0xe   :  { %v423_v56 = vpack.c.bf16 %v229_v54, %v228_v53  ;;  %v426_v58 = vpack.c.bf16 %v231_v57, %v230_v55  ;;  %v29_v62 = vld [vmem:[%s627_s2] sm:$0x3]  ;;  %v233_v10 = vld [vmem:[%s626_s5 + $0x28] sm:$0xff]  ;;  %v234_v12 = vld [vmem:[%s626_s5 + $0x30] sm:$0xff] }
   0xf   :  { %401 = vmatpush3.bf16.msra.mxu1 %v400_v23  ;;  %v34_v0 = vrot.slane %v29_v62, %v33_v61  ;;  %v38_v1 = vrot.slane %v29_v62, %v37_v63  ;;  %v232_v9 = vld [vmem:[%s626_s5 + $0x20] sm:$0xff]  ;;  %v235_v13 = vld [vmem:[%s626_s5 + $0x38] sm:$0xff] }
  0x10   :  { %403 = vmatprep.subr.bf16.mxu1 %v402_v24  ;;  %424 = vmatpush3.bf16.msra.mxu0 %v423_v56  ;;  %v429_v11 = vpack.c.bf16 %v233_v10, %v232_v9  ;;  %v432_v14 = vpack.c.bf16 %v235_v13, %v234_v12  ;;  %v324_v16 = vld [vmem:[%s628_s4] ss:$0 sm:$0xff] }
  0x11   :  { %425 = vmatprep.subr.bf16.mxu0 %v438_v52  ;;  %v325_v21 = vld [vmem:[%s629_s6] ss:$0 sm:$0xff] }
  0x13   :  { %405 = vmatpush3.bf16.msra.mxu1 %v404_v29 }
  0x14   :  { %407 = vmatprep.subr.bf16.mxu1 %v406_v30  ;;  %427 = vmatpush3.bf16.msra.mxu0 %v426_v58 }
  0x15   :  { %428 = vmatprep.subr.bf16.mxu0 %v438_v52 }
  0x17   :  { %409 = vmatpush3.bf16.msra.mxu1 %v408_v35 }
  0x18   :  { %411 = vmatprep.subr.bf16.mxu1 %v410_v36  ;;  %430 = vmatpush3.bf16.msra.mxu0 %v429_v11 }
  0x19   :  { %431 = vmatprep.subr.bf16.mxu0 %v438_v52 }
  0x1b   :  { %413 = vmatpush3.bf16.msra.mxu1 %v412_v41 }
  0x1c   :  { %415 = vmatprep.subr.bf16.mxu1 %v414_v42  ;;  %433 = vmatpush3.bf16.msra.mxu0 %v432_v14 }
  0x1f   :  { %417 = vmatpush3.bf16.msra.mxu1 %v416_v45 }
  0x20   :  { %419 = vmatprep.subr.bf16.mxu1 %v418_v48 }
  0x23   :  { %421 = vmatpush3.bf16.msra.mxu1 %v420_v51 }
  0xd7   :  { %v111_v3 = vpop.f32.mrb[0].mxu0 }
  0xd8   :  { %v112_v4 = vadd.f32 %v111_v3, %v34_v0  ;;  %v113_v5 = vpop.f32.mrb[1].mxu0 }
  0xd9   :  { %v114_v6 = vadd.f32 %v113_v5, %v38_v1 }
  0xda   :  { %v116_v8 = vmax.f32 %v112_v4, 0.0 }
  0xdb   :  { %v117_v7 = vmax.f32 %v114_v6, 0.0 }
  0xdd   :  { %221 = vmatprep.mubr.f32.mxu1 %v117_v7 }
  0xde   :  { %222 = vmatmul.mubr.f32.vlgmr.msra.gmra.mrb[0].mxu1 %v116_v8 }
 0x1b1   :  { %v359_v15 = vpop.f32.mrb[0].mxu1 }
 0x1b2   :  { %v360_v17 = vpop.f32.mrb[1].mxu1 }
 0x1b3   :  { %v361_v18 = vadd.f32 %v360_v17, %v359_v15 }
 0x1b5   :  { %v224_v19 = vadd.f32 %v361_v18, %v324_v16 }
 0x1b7   :  { %v227_v20 = vmax.f32 %v224_v19, 0.0 }
 0x1b9   :  { %388 = vmatmul.mubr.msk.f32.vlgmr.msra.gmra.mrb[2].mxu0 %vm243_vm2, %v227_v20 }
 0x28c   :  { %v313_v22 = vpop.f32.mrb[2].mxu0 }
 0x28d   :  { %v314_v23 = vadd.f32 %v325_v21, %v313_v22  ;;  %v389_v24 = vpop.f32.mrb[3].mxu0 }
 0x28f   :  { %318 = vst.msk [vmem:[%s630_s7] sm:$0xff] %vm317_vm3, %v314_v23 }

</bundles_post_ra>
